<compile_context>
chip_gen: v7x
topology: tpu7x:2x2x1
jax: 0.10.0
libtpu: 0.0.40
codegen_flags: <defaults>
</compile_context>

<pallas_src>
import math
from functools import partial

import jax
import jax.numpy as jnp
from jax import lax
from jax.experimental import pallas as pl
from jax.experimental.pallas import tpu as pltpu


def _fused_embedding_kernel(a_ref, wcat_ref, peb_ref, o_ref, *, n_feat, seq_num):
    # a_ref:    (R, n_feat+1)      rows = BT*L (batch-major); last column = seq id (float)
    # wcat_ref: (n_feat+seq_num,D) [conv tap0; tap1; tap2; W_temp; emb_table] (resident)
    # peb_ref:  (R, D) f32         sinusoidal pe + temporal bias, tiled over BT (resident)
    # o_ref:    (R, D)
    R = o_ref.shape[0]

    a = a_ref[...].astype(jnp.float32)                      # (R, n_feat+1)
    feats = a[:, :n_feat]                                   # (R, 3C+T)
    # trunc-to-int matches .long() for non-negative in-range ids
    ids = a[:, n_feat:n_feat + 1].astype(jnp.int32)         # (R, 1)
    iota = lax.broadcasted_iota(jnp.int32, (R, seq_num), 1)
    onehot = (ids == iota).astype(jnp.float32)              # (R, S)  gather-free

    A = jnp.concatenate([feats, onehot], axis=-1)           # (R, 3C+T+S)
    acc = jnp.dot(A, wcat_ref[...].astype(jnp.float32),
                  preferred_element_type=jnp.float32)       # single MXU launch
    o_ref[...] = (acc + peb_ref[...]).astype(o_ref.dtype)   # lane-dense (R, D) store


def _sinusoidal_pe(L, d_model):
    # matches PositionalEmbedding: pe[:, 0::2]=sin, pe[:, 1::2]=cos (kept in f32)
    pos = jnp.arange(L, dtype=jnp.float32)[:, None]
    div = jnp.exp(jnp.arange(0, d_model, 2, dtype=jnp.float32)
                  * (-math.log(10000.0) / d_model))
    ang = pos * div                                          # (L, d_model//2)
    return jnp.stack([jnp.sin(ang), jnp.cos(ang)], axis=-1).reshape(L, d_model)


def _pick_bt(B, L, D, out_itemsize):
    """Batch rows per block: aim for >=~1024-row tiles (HBM roofline), keep the
    double-buffered blocks inside a conservative budget (v7x: 64 MiB physical VMEM),
    require BT | B and BT*L % 8 == 0 (BlockSpec (8,128) rule), and prefer >=2 grid
    steps so both v7x TensorCores get work."""
    budget = 24 << 20
    per_bt = L * max(D, 128) * out_itemsize * 2 + (L * 128 * 4) * 2
    cap = max(1, budget // max(per_bt, 1))
    want = max(1, -(-1024 // L))
    bt = max(1, min(B, want, cap))
    while bt > 1 and (B % bt or (bt * L) % 8):
        bt -= 1
    if (bt * L) % 8:                 # fall back to a single full block (full-dim exempt)
        bt = B
    if B // bt < 2:                  # keep >=2 parallel steps when possible (v7x: 2 TCs)
        for c in range(bt - 1, 0, -1):
            if B % c == 0 and (c * L) % 8 == 0 and B // c >= 2:
                bt = c
                break
    return bt


def custom_embedding(x, x_mark, w_conv, w_temp, b_temp, emb_table):
    """
    x:         (B, L, c_in)
    x_mark:    (B, L, temporal_size + 1); last column holds integer seq ids (as float)
    w_conv:    (3, c_in, d_model)   tap-major (== torch conv weight permuted (2, 1, 0))
    w_temp:    (temporal_size, d_model)
    b_temp:    (d_model,)
    emb_table: (seq_num, d_model)
    returns    (B, L, d_model)
    """
    B, L, C = x.shape
    T = x_mark.shape[-1] - 1
    seq_num, D = emb_table.shape
    assert w_conv.shape == (3, C, D) and w_temp.shape == (T, D)
    out_dtype = x.dtype
    out_isz = jnp.dtype(out_dtype).itemsize

    # ---- wrapper-side layout plumbing (O(B*L*small) vs the (B,L,D) output) ----------
    # circular k=3 conv expressed as three pre-shifted copies, merged with x_mark into
    # ONE activation tensor, flattened to (B*L, 3C+T+1) so the kernel is pure 2D.
    x_prev = jnp.roll(x, 1, axis=1)       # x_pad[l]   -> tap 0 (circular)
    x_next = jnp.roll(x, -1, axis=1)      # x_pad[l+2] -> tap 2 (circular)
    merged = jnp.concatenate([x_prev, x, x_next, x_mark], axis=-1)   # (B, L, 3C+T+1)
    n_feat = 3 * C + T
    merged2 = merged.reshape(B * L, n_feat + 1)

    # single fused weight matrix -> one MXU launch per step
    w_cat = jnp.concatenate(
        [w_conv[0], w_conv[1], w_conv[2], w_temp, emb_table], axis=0
    ).astype(jnp.float32)                                            # (3C+T+S, D)

    BT = _pick_bt(B, L, D, out_isz)
    R = BT * L
    # positional table (f32) with temporal bias pre-folded, tiled to the block's rows
    peb = jnp.tile(_sinusoidal_pe(L, D) + b_temp.astype(jnp.float32)[None, :], (BT, 1))

    kernel = partial(_fused_embedding_kernel, n_feat=n_feat, seq_num=seq_num)

    # explicit VMEM budget (stay well inside v7x's 64 MiB physical VMEM)
    lane = 128
    pad = lambda n: -(-n // lane) * lane
    est = (2 * R * pad(n_feat + 1) * 4                       # activation blocks (x2 bufs)
           + 2 * R * pad(D) * out_isz                        # output blocks (x2 bufs)
           + R * pad(D) * 4                                  # resident peb
           + (n_feat + seq_num + 8) * pad(D) * 4             # resident w_cat
           + 3 * R * pad(max(D, n_feat + seq_num)) * 4)      # A / onehot / acc temps
    vmem_limit = int(min(max(2 * est, 32 << 20), 48 << 20))

    out2 = pl.pallas_call(
        kernel,
        out_shape=jax.ShapeDtypeStruct((B * L, D), out_dtype),
        grid_spec=pltpu.PrefetchScalarGridSpec(
            num_scalar_prefetch=0,
            grid=(B // BT,),
            in_specs=[
                pl.BlockSpec((R, n_feat + 1), lambda b: (b, 0)),        # activations
                pl.BlockSpec((n_feat + seq_num, D), lambda b: (0, 0)),  # fused weights
                pl.BlockSpec((R, D), lambda b: (0, 0)),                 # pe + bias
            ],
            out_specs=pl.BlockSpec((R, D), lambda b: (b, 0)),
        ),
        compiler_params=pltpu.CompilerParams(
            dimension_semantics=("parallel",),
            vmem_limit_bytes=vmem_limit),
    )(merged2, w_cat, peb)

    return out2.reshape(B, L, D)


def _reference(x, x_mark, w_conv, w_temp, b_temp, emb_table):
    B, L, C = x.shape
    T = x_mark.shape[-1] - 1
    D = emb_table.shape[-1]
    xpad = jnp.concatenate([x[:, -1:, :], x, x[:, :1, :]], axis=1)
    conv = sum(jnp.einsum('blc,cd->bld', xpad[:, k:k + L, :], w_conv[k])
               for k in range(3))
    pe = _sinusoidal_pe(L, D)[None]
    temporal = jnp.einsum('blt,td->bld', x_mark[..., :T], w_temp) + b_temp
    ids = x_mark[..., -1].astype(jnp.int32)
    seqid = emb_table[ids]
    return conv + pe + temporal + seqid


if __name__ == "__main__":
    key = jax.random.PRNGKey(0)
    B, L, c_in = 2, 16, 4
    d_model, temporal_size, seq_num = 128, 4, 8

    ks = jax.random.split(key, 6)
    x = jax.random.normal(ks[0], (B, L, c_in), dtype=jnp.float32)
    mark = jax.random.normal(ks[1], (B, L, temporal_size), dtype=jnp.float32)
    ids = jax.random.randint(ks[2], (B, L, 1), 0, seq_num).astype(jnp.float32)
    x_mark = jnp.concatenate([mark, ids], axis=-1)           # (B, L, T+1)

    w_conv = jax.random.normal(ks[3], (3, c_in, d_model), dtype=jnp.float32) \
             * math.sqrt(2.0 / (3 * c_in))                   # ~ kaiming fan_in
    w_temp = jax.random.normal(ks[4], (temporal_size, d_model), dtype=jnp.float32) \
             * math.sqrt(1.0 / temporal_size)
    b_temp = jax.random.normal(ks[5], (d_model,), dtype=jnp.float32) * 0.02
    emb_table = jax.random.normal(ks[5], (seq_num, d_model), dtype=jnp.float32)

    out = custom_embedding(x, x_mark, w_conv, w_temp, b_temp, emb_table)
    out = jax.block_until_ready(out)

    ref = _reference(x, x_mark, w_conv, w_temp, b_temp, emb_table)
    assert out.shape == (B, L, d_model)
    assert jnp.allclose(out, ref, atol=1e-4, rtol=1e-4), "mismatch vs reference"
    print("KERNEL_OK")
</pallas_src>

<mosaic_0001>
module attributes {stable_mosaic.version = 11 : i64} {
  func.func @_fused_embedding_kernel(%arg0: i32, %arg1: memref<16x17xf32, #tpu.memory_space<vmem>>, %arg2: memref<24x128xf32, #tpu.memory_space<vmem>>, %arg3: memref<16x128xf32, #tpu.memory_space<vmem>>, %arg4: memref<16x128xf32, #tpu.memory_space<vmem>>) attributes {dimension_semantics = [#tpu.dimension_semantics<parallel>], iteration_bounds = array<i64: 2>, scalar_prefetch = 0 : i64, scratch_operands = 0 : i64, tpu.core_type = #tpu.core_type<tc>, window_params = [{transform_indices = @transform_0, window_bounds = array<i64: 16, 17>}, {pipeline_mode = #tpu.pipeline_mode<synchronous>, transform_indices = @transform_1, window_bounds = array<i64: 24, 128>}, {pipeline_mode = #tpu.pipeline_mode<synchronous>, transform_indices = @transform_2, window_bounds = array<i64: 16, 128>}, {transform_indices = @transform_3, window_bounds = array<i64: 16, 128>}]} {
    %c0 = arith.constant 0 : index
    %c0_0 = arith.constant 0 : index
    %0 = vector.load %arg1[%c0, %c0_0] : memref<16x17xf32, #tpu.memory_space<vmem>>, vector<16x17xf32>
    %1 = vector.extract_strided_slice %0 {offsets = [0, 0], sizes = [16, 16], strides = [1, 1]} : vector<16x17xf32> to vector<16x16xf32>
    %2 = vector.extract_strided_slice %0 {offsets = [0, 16], sizes = [16, 1], strides = [1, 1]} : vector<16x17xf32> to vector<16x1xf32>
    %3 = arith.fptosi %2 : vector<16x1xf32> to vector<16x1xi32>
    %4 = tpu.iota {dimensions = array<i32: 1>} : vector<16x8xi32>
    %5 = vector.broadcast %3 : vector<16x1xi32> to vector<16x8xi32>
    %6 = arith.cmpi eq, %5, %4 : vector<16x8xi32>
    %7 = arith.extui %6 : vector<16x8xi1> to vector<16x8xi32>
    %8 = arith.sitofp %7 : vector<16x8xi32> to vector<16x8xf32>
    %9 = tpu.concatenate %1, %8 in 1 : vector<16x16xf32>, vector<16x8xf32> -> vector<16x24xf32>
    %c0_1 = arith.constant 0 : index
    %c0_2 = arith.constant 0 : index
    %10 = vector.load %arg2[%c0_1, %c0_2] : memref<24x128xf32, #tpu.memory_space<vmem>>, vector<24x128xf32>
    %cst = arith.constant dense<0.000000e+00> : vector<16x128xf32>
    %11 = tpu.matmul %9, %10, %cst {dimension_numbers = #tpu.dot_dimension_numbers<[1], [0], [0], [1], [0, 0, 1, 1], [], []>} : vector<16x24xf32>, vector<24x128xf32>, vector<16x128xf32> -> vector<16x128xf32>
    %c0_3 = arith.constant 0 : index
    %c0_4 = arith.constant 0 : index
    %12 = vector.load %arg3[%c0_3, %c0_4] : memref<16x128xf32, #tpu.memory_space<vmem>>, vector<16x128xf32>
    %13 = arith.addf %11, %12 : vector<16x128xf32>
    %c0_5 = arith.constant 0 : index
    %c0_6 = arith.constant 0 : index
    %14 = vector.load %arg4[%c0_5, %c0_6] : memref<16x128xf32, #tpu.memory_space<vmem>>, vector<16x128xf32>
    tpu.vector_store %arg4[%c0_5, %c0_6], %13 {strides = array<i32>} : memref<16x128xf32, #tpu.memory_space<vmem>>, vector<16x128xf32>,
    return
  }
  func.func @transform_0(%arg0: i32) -> (i32, i32) {
    %c0_i32 = arith.constant 0 : i32
    %c0_i32_0 = arith.constant 0 : i32
    return %arg0, %c0_i32 : i32, i32
  }
  func.func @transform_1(%arg0: i32) -> (i32, i32) {
    %c0_i32 = arith.constant 0 : i32
    %c0_i32_0 = arith.constant 0 : i32
    %c0_i32_1 = arith.constant 0 : i32
    return %c0_i32, %c0_i32_0 : i32, i32
  }
  func.func @transform_2(%arg0: i32) -> (i32, i32) {
    %c0_i32 = arith.constant 0 : i32
    %c0_i32_0 = arith.constant 0 : i32
    %c0_i32_1 = arith.constant 0 : i32
    return %c0_i32, %c0_i32_0 : i32, i32
  }
  func.func @transform_3(%arg0: i32) -> (i32, i32) {
    %c0_i32 = arith.constant 0 : i32
    %c0_i32_0 = arith.constant 0 : i32
    return %arg0, %c0_i32 : i32, i32
  }
}

</mosaic_0001>

<bundles_post_ra>
// kernel: tpu_custom_call.1
= control target key start
LH: loop header
LB: loop body
LE: loop exit
PB: predicated region body
PF: predicated region fallthrough
CT: control target
= control target key end

     0   :  { %8 = vsyncpa [#allocation3], 0  ;;  %s662_s0 = inlined_call_operand.vmem [shape: f32[32,17], index: 0, kind: input, shape index: {}]   ;;  %s663_s1 = inlined_call_operand.vmem [shape: f32[24,128], index: 1, kind: input, shape index: {}]   ;;  %s664_s2 = inlined_call_operand.vmem [shape: f32[16,128], index: 2, kind: input, shape index: {}]   ;;  %s665_s3 = inlined_call_operand.hbm [shape: f32[32,128], index: 3, kind: output, shape index: {}]  }
   0x1   :  { %10 = vsyncpa [#allocation3 + $0x1], 0  ;;  %s545_s12 = smov 0   ;;  %s547_s13 = smov 0  }
   0x2   :  { %s549_s14 = smov 0   ;;  %s551_s15 = smov 0  }
   0x3 LB: > { %s566_s16 = sadd.s32 4294967295, %s517_s15   ;;  %s366_s17 = sadd.s32 4294967294, %s517_s15   ;;  %s517_s15 = sphi %s551_s15, %s671_s15   ;;  %s513_s14 = sphi %s549_s14, %s670_s14   ;;  %s509_s13 = sphi %s547_s13, %s669_s13   ;;  %s505_s12 = sphi %s545_s12, %s668_s12  }
   0x4   : > { %s570_s18 = sadd.s32 1, %s517_s15   ;;  %s91_s19 = sadd.s32 1, %s513_s14 }
   0x5   : > { %s88_s20 = ssub.s32 %s517_s15, %s570_s18  ;;  %p101_p0 = scmp.ne.s32.totalorder %s513_s14, %s509_s13 }
   0x6   : > { %p89_p1 = scmp.eq.s32.totalorder %s88_s20, 0  ;;  %p102_p2 = scmp.eq.s32.totalorder %s566_s16, 1 }
   0x7   : > { %p107_p3 = scmp.ne.s32.totalorder %s509_s13, %s505_s12  ;;  %p108_p4 = scmp.eq.s32.totalorder %s366_s17, 1 }
   0x8   : > { %s581_s21 = scalar_select %p89_p1, %s513_s14, %s91_s19  }
   0x9   : > { %p583_p5 = por %p102_p2, %p101_p0  ;;  %p587_p6 = por %p108_p4, %p107_p3 }
   0xa   : > { %p369_p7 = scmp.ge.s32.totalorder %s517_s15, 1  ;;  %p141_p8 = scmp.lt.s32.totalorder %s517_s15, 3 }
   0xc   : > { %p142_p9 = pnand %p369_p7, %p141_p8 }
   0xd   : > { %s371_s24 = sshll.u32 (!%p142_p9), %s566_s16, 1  ;;  %v519_v0 = vmov (!%p142_p9), 16   ;;  %v201_v7 = vld [vmem:[%s663_s1] sm:$0xff] (!%p142_p9)  ;;  %v202_v8 = vld [vmem:[%s663_s1 + $0x8] sm:$0xff] (!%p142_p9)  ;;  %v176_v10 = vlaneseq (!%p142_p9)  ;;  %v203_v11 = vld [vmem:[%s663_s1 + $0x10] sm:$0xff] (!%p142_p9)  ;;  %v520_v15 = vmov (!%p142_p9), 0.0  }
   0xe   : > { %145 = sbr.rel (%p142_p9) target bundleno = 514 (0x202), region = 32  ;;  %449 = vset.pattern.permute.xlu0 (!%p142_p9), %v519_v0  ;;  %p166_p10 = scmp.lt.s32.totalorder (!%p142_p9), %s371_s24, 3  ;;  %v397_v9 = vpack.c.bf16 (!%p142_p9), %v202_v8, %v201_v7  ;;  %vm198_vm2 = vcmask (!%p142_p9), 130048   ;;  %vm206_vm3 = vcmask (!%p142_p9), 195584   ;;  %v205_v24 = vld [vmem:[%s664_s2 + $0x8] sm:$0xff] (!%p142_p9)  ;;  %v204_v25 = vld [vmem:[%s664_s2] sm:$0xff] (!%p142_p9) }
   0xf   : > { %v177_v12 = vand.u32 (!%p142_p9), 127, %v176_v10  ;;  %s521_s8 = smov (!%p142_p9), 16   ;;  %s162_s9 = sand.u32 (!%p142_p9), 1, %s509_s13  }
  0x10   : > { %398 = vmatprep.subr.bf16.mxu0 (!%p142_p9), %v397_v9  ;;  %s370_s10 = sshll.u32 (!%p142_p9), %s162_s9, 4  ;;  %s522_s4 = smov (!%p142_p9), [#allocation2]  }
  0x11   : > { %400 = vmatpush3.bf16.msra.mxu0 (!%p142_p9), %v397_v9  ;;  %s164_s19 = scalar_lea.vmem (!%p142_p9), [#allocation2], %s370_s10  ;;  %s459_s5 = sshll.u32 (!%p142_p9), %s522_s4, 4  ;;  %s460_s5 = int_to_ptr.vmem [resolvable:$false] %s459_s5 }
  0x12   : > { %392 = vmatprep.subr.mxu0 (!%p142_p9), %v203_v11  ;;  %s304_s20 = sshll.u32 (!%p142_p9), %s164_s19, 4  ;;  %s461_s6 = scalar_lea.vmem (!%p142_p9), %s460_s5, 512  ;;  %s614_s20 = int_to_ptr.vmem [resolvable:$true] %s304_s20 }
  0x13   : > { %s455_s30 = scalar_lea.vmem (!%p142_p9), %s614_s20, 256  ;;  %p462_p0 = scmp.lt.s32.totalorder (!%p142_p9), %s614_s20, %s460_s5 }
  0x14   : > { %p456_p11 = scmp.ne.s32.totalorder (!%p142_p9), %s614_s20, %s455_s30  ;;  %p463_p1 = scmp.lt.s32.totalorder (!%p142_p9), %s461_s6, %s455_s30 }
  0x15   : > { %s673_s24 = smov (!%p166_p10, %s371_s24), 3  ;;  %393 = vmatpush3.msra.mxu0 %v203_v11 }
  0x16   : > { %s372_s25 = sshll.u32 %s673_s24, 3  ;;  %s382_s24 = sshll.u32 %s566_s16, 8 }
  0x17   : > { %s169_s28 = scalar_lea.vmem %s662_s0, %s372_s25  ;;  %s619_s29 = scalar_lea.hbm %s665_s3, %s382_s24 }
  0x18   : > { %v172_v1 = vld [vmem:[%s169_s28] sm:$0xff]  ;;  %v173_v2 = vld [vmem:[%s169_s28 + $0x8] sm:$0xff]  ;;  %s621_s16 = scalar_lea.sflag [#allocation3], %s162_s9  ;;  %p457_p12 = pnand %p456_p11, %p583_p5 }
  0x19   : > { %v401_v3 = vtrunc.f32 %v172_v1  ;;  %v403_v4 = vtrunc.f32 %v173_v2  ;;  %p464_p2 = por %p463_p1, %p462_p0 }
  0x1a   : > { %p458_p13 = pneg %p457_p12 }
  0x1b   : > { %v402_v5 = vcvt.f32.s32 %v401_v3  ;;  %v404_v6 = vcvt.f32.s32 %v403_v4 }
  0x1c   : > { %p465_p3 = pnand %p464_p2, %p458_p13 }
  0x1d   : > { %179 = vperm.xlu0 %449, %v402_v5  }
  0x21   : > { %182 = vperm.xlu0 %449, %v404_v6  }
  0x9c   : > { %v180_v13 = vpop.permute.xlu0 %179 }
  0x9d   : > { %vm184_vm0 = vcmp.eq.s32.totalorder %v180_v13, %v177_v12 }
  0x9e   : > { %v373_v16 = vsel %vm184_vm0, 1.0, %v520_v15 }
  0xa0   : > { %v183_v14 = vpop.permute.xlu0 %182 }
  0xa1   : > { %vm185_vm1 = vcmp.eq.s32.totalorder %v183_v14, %v177_v12 }
  0xa2   : > { %v374_v17 = vsel %vm185_vm1, 1.0, %v520_v15 }
  0xa3   : > { %v450_v18 = vpack.i.bf16 %v374_v17, %v373_v16 }
  0xa5   : > { %451 = vrot.lane.b32.xlu1 %v450_v18, %s521_s8 }
 0x117   : > { %v452_v19 = vpop.permute.xlu1 %451 }
 0x118   : > { %v454_v20 = vunpack.i.h.bf16 %v452_v19  ;;  %v453_v21 = vunpack.i.l.bf16 %v452_v19 }
 0x11a   : > { %v199_v22 = vsel %vm198_vm2, %v172_v1, %v453_v21  ;;  %v200_v23 = vsel %vm198_vm2, %v173_v2, %v454_v20 }
 0x11b   : > { %394 = vmatprep.mubr.msk.f32.mxu0 %vm206_vm3, %v199_v22 }
 0x11c   : > { %395 = vmatmul.mubr.msk.f32.vlgmr.msra.gmra.mrb[0].mxu0 %vm206_vm3, %v200_v23 }
 0x1ef   : > { %v396_v26 = vpop.f32.mrb[0].mxu0 }
 0x1f0   : > { %v285_v27 = vadd.f32 %v396_v26, %v205_v24  ;;  %v279_v28 = vpop.f32.mrb[1].mxu0 }
 0x1f1   : > { %v280_v29 = vadd.f32 %v279_v28, %v204_v25 }
 0x1f2   : > { %289 = vst [vmem:[%s164_s19 + $0x8] sm:$0xff] %v285_v27 }
 0x1f3   : > { %288 = vst [vmem:[%s164_s19] sm:$0xff] %v280_v29 }
 0x1f4   : > { %468 = shalt.err (!%p465_p3)
}
 0x1f5   : > { %s469_s7 = scalar_lea.hbm %s619_s29, 256  ;;  %s473_s10 = scalar_lea.hbm %s665_s3, 512 }
 0x1f6   : > { %p470_p4 = scmp.ne.s32.totalorder %s619_s29, %s469_s7  ;;  %p474_p9 = scmp.lt.u32.totalorder %s619_s29, %s665_s3 }
 0x1f7   : > { %p475_p10 = scmp.lt.u32.totalorder %s473_s10, %s469_s7  ;;  %p477_p12 = scmp.lt.u32.totalorder %s469_s7, %s619_s29 }
 0x1f8   : > { %p471_p7 = pnand %p470_p4, %p583_p5 }
 0x1f9   : > { %p476_p11 = por %p475_p10, %p474_p9 }
 0x1fa   : > { %p472_p8 = pneg %p471_p7 }
 0x1fb   : > { %p478_p13 = por %p477_p12, %p476_p11 }
 0x1fd   : > { %p479_p0 = pnand %p478_p13, %p472_p8 }
 0x1ff   : > { %482 = shalt.err (!%p479_p0)
}
 0x200   : > { %s523_s19 = smov 128   ;;  %s524_s24 = smov 8  }
 0x201   : > { %405 = dma.vmem_to_hbm [thread:$0]  (%p583_p5), %s614_s20, 256, %s619_s29, %s621_s16, %s523_s19, %s523_s19, %s524_s24  }
 0x202 PF: > { %p411_p1 = scmp.ge.s32.totalorder %s517_s15, 2  ;;  %s319_s25 = sand.u32 1, %s505_s12  }
 0x203   : > { %s320_s26 = scalar_lea.sflag [#allocation3], %s319_s25 }
 0x204   : > { %p408_p2 = pnand %p411_p1, %p587_p6 }
 0x206   : > { %500 = dma.done.wait (!%p408_p2), %s320_s26, 256  }
 0x207   : > { %502 = vsyncadd (!%p408_p2), %s320_s26, 4294967040  ;;  %p13_p3 = scmp.ge.s32.totalorder %s570_s18, 4   ;;  %s668_s12 = smov %s509_s13 }
 0x208   : > { %s669_s13 = smov %s513_s14  ;;  %s670_s14 = smov %s581_s21 }
 0x209   : > { %s671_s15 = smov %s570_s18  ;;  %15 = sbr.rel (!%p13_p3) target bundleno = 3 (0x3), region = 67 }
 0x210   :  { %325 = vsyncpa [#allocation3], 1 }
 0x211   :  { %327 = vsyncpa [#allocation3 + $0x1], 1 }

</bundles_post_ra>
